<compile_context>
chip_gen: v7x
topology: tpu7x:2x2x1
jax: 0.10.0
libtpu: 0.0.40
codegen_flags: <defaults>
</compile_context>

<pallas_src>
import functools

import jax
import jax.numpy as jnp
from jax.experimental import pallas as pl
from jax.experimental.pallas import tpu as pltpu


def _round_up(x, m):
    return ((x + m - 1) // m) * m


def _fused_kernel(acts_ref, enc_ref, w_ref, b_ref, out_ref, *, hp, lp):
    """One fused step: connected -> attn/softmax -> combine -> GRU cell.

    acts_ref: (2, 2*hp) f32   row0 = [x1 | x2], row1 = [h | 0]
    enc_ref : (lp, hp)  f32   padded encoder_output
    w_ref   : (2*hp, 5*hp+lp) bf16 packed weights [Wc | Wa | Wm | Wrz | Wn]
    b_ref   : (8, max(2*hp, lp)) f32 packed biases
    out_ref : (1, hp)   f32   new hidden state (== output of the single GRU step)
    """
    f32 = jnp.float32
    bf = jnp.bfloat16
    c_wa = hp
    c_wm = hp + lp
    c_wrz = 2 * hp + lp
    c_wn = 4 * hp + lp

    x12 = acts_ref[0:1, :]                       # (1, 2hp)
    h = acts_ref[1:2, 0:hp]                      # (1, hp)
    h_bf = h.astype(bf)
    b = b_ref[...]                               # (8, BW)

    # connected_layer(cat(x1, x2)) + ReLU  — single K=2hp MXU pass.
    emb = jnp.dot(x12.astype(bf), w_ref[:, 0:hp],
                  preferred_element_type=f32) + b[0:1, 0:hp]
    emb = jnp.maximum(emb, 0.0)
    # TODO(synk): embedding_dropout treated as identity (inference-mode forward).
    emb_bf = emb.astype(bf)

    # attn(cat(embedded, hidden)) -> softmax over max_length (deferred norm).
    # Padded logit lanes carry a -1e30 bias, so exp() underflows to exactly 0.
    eh = jnp.concatenate([emb_bf, h_bf], axis=1)             # (1, 2hp), 128-aligned
    logits = jnp.dot(eh, w_ref[:, c_wa:c_wa + lp],
                     preferred_element_type=f32) + b[1:2, 0:lp]
    logits = logits - jnp.max(logits, axis=-1, keepdims=True)
    p = jnp.exp(logits)                                       # (1, lp)
    inv_s = pl.reciprocal(jnp.sum(p, axis=-1, keepdims=True), approx=True)
    ctx = jnp.dot(p.astype(bf), enc_ref[...].astype(bf),
                  preferred_element_type=f32) * inv_s         # (1, hp)

    # atten_combine(cat(embedded, ctx)) + ReLU — single K=2hp dot.
    ec = jnp.concatenate([emb_bf, ctx.astype(bf)], axis=1)
    o = jnp.dot(ec, w_ref[:, c_wm:c_wm + hp],
                preferred_element_type=f32) + b[2:3, 0:hp]
    o = jnp.maximum(o, 0.0)
    o_bf = o.astype(bf)

    # GRU cell (PyTorch gate order r, z, n).  r and z fused into one
    # K=2hp / N=2hp dot with pre-summed biases; n-gate parts kept separate.
    oh = jnp.concatenate([o_bf, h_bf], axis=1)                # (1, 2hp)
    rz = jax.nn.sigmoid(
        jnp.dot(oh, w_ref[:, c_wrz:c_wrz + 2 * hp],
                preferred_element_type=f32) + b[3:4, 0:2 * hp])
    r = rz[:, 0:hp]
    z = rz[:, hp:2 * hp]
    gin = jnp.dot(o_bf, w_ref[0:hp, c_wn:c_wn + hp],
                  preferred_element_type=f32) + b[4:5, 0:hp]
    ghn = jnp.dot(h_bf, w_ref[hp:2 * hp, c_wn:c_wn + hp],
                  preferred_element_type=f32) + b[5:6, 0:hp]
    n = jnp.tanh(gin + r * ghn)

    # Pad lanes: r=z=0.5, n=0, h_pad=0  =>  h_new_pad = 0 (self-consistent).
    out_ref[...] = (1.0 - z) * n + z * h


def prepare_params(params):
    """One-off weight preprocessing: split/transpose/pad/pack -> 2 static arrays."""
    f32 = jnp.float32
    H = params["fc_w"].shape[0]
    L = params["attn_w"].shape[0]
    Hp = max(128, _round_up(H, 128))
    Lp = max(128, _round_up(L, 128))
    BW = max(2 * Hp, Lp)

    def pad_t(w, rows, cols):
        # PyTorch Linear weight slice (out, in) -> transposed + zero-padded (rows, cols)
        wt = jnp.asarray(w, f32).T
        return jnp.pad(wt, ((0, rows - wt.shape[0]), (0, cols - wt.shape[1])))

    wc = jnp.asarray(params["fc_w"], f32)        # (H, 2H)
    wa = jnp.asarray(params["attn_w"], f32)      # (L, 2H)
    wm = jnp.asarray(params["comb_w"], f32)      # (H, 2H)
    wih = jnp.asarray(params["gru_w_ih"], f32)   # (3H, H) gate order r,z,n
    whh = jnp.asarray(params["gru_w_hh"], f32)
    bih = jnp.asarray(params["gru_b_ih"], f32)
    bhh = jnp.asarray(params["gru_b_hh"], f32)

    # cat(a, b) @ W.T  ==  [a | b] @ [[W1.T], [W2.T]]   (stack halves vertically)
    Wc = jnp.concatenate([pad_t(wc[:, :H], Hp, Hp), pad_t(wc[:, H:], Hp, Hp)], axis=0)
    Wa = jnp.concatenate([pad_t(wa[:, :H], Hp, Lp), pad_t(wa[:, H:], Hp, Lp)], axis=0)
    Wm = jnp.concatenate([pad_t(wm[:, :H], Hp, Hp), pad_t(wm[:, H:], Hp, Hp)], axis=0)
    Wr = jnp.concatenate([pad_t(wih[0:H], Hp, Hp), pad_t(whh[0:H], Hp, Hp)], axis=0)
    Wz = jnp.concatenate([pad_t(wih[H:2 * H], Hp, Hp), pad_t(whh[H:2 * H], Hp, Hp)], axis=0)
    Wrz = jnp.concatenate([Wr, Wz], axis=1)                                   # (2Hp, 2Hp)
    Wn = jnp.concatenate([pad_t(wih[2 * H:], Hp, Hp), pad_t(whh[2 * H:], Hp, Hp)], axis=0)
    w_packed = jnp.concatenate([Wc, Wa, Wm, Wrz, Wn], axis=1).astype(jnp.bfloat16)

    def row(v, fill_start=None, fill_stop=None, fill=0.0):
        v = jnp.asarray(v, f32).reshape(-1)
        r = jnp.zeros((BW,), f32).at[: v.shape[0]].set(v)
        if fill_start is not None:
            r = r.at[fill_start:fill_stop].set(fill)
        return r

    row_bc = row(params["fc_b"])
    row_ba = row(params["attn_b"], fill_start=L, fill_stop=Lp, fill=-1e30)
    row_bm = row(params["comb_b"])
    row_brz = jnp.zeros((BW,), f32)
    row_brz = row_brz.at[0:H].set(bih[0:H] + bhh[0:H])               # r bias (pre-summed)
    row_brz = row_brz.at[Hp:Hp + H].set(bih[H:2 * H] + bhh[H:2 * H])  # z bias (pre-summed)
    row_bin = row(bih[2 * H:])
    row_bhn = row(bhh[2 * H:])
    zero = jnp.zeros((BW,), f32)
    b_packed = jnp.stack([row_bc, row_ba, row_bm, row_brz, row_bin, row_bhn, zero, zero])

    return {"w": w_packed, "b": b_packed, "H": H, "L": L, "Hp": Hp, "Lp": Lp}


def double_atten_combine_encoder_rnn(input_seq1, input_seq2, hidden,
                                     encoder_output, packed):
    """input_seq1/2: (1,1,H), hidden: (1,1,H), encoder_output: (max_length, H).
    `packed` comes from prepare_params.  Returns (outputs (1,1,H), hidden (1,1,H))."""
    f32 = jnp.float32
    H, L, Hp, Lp = packed["H"], packed["L"], packed["Hp"], packed["Lp"]

    x1 = input_seq1.reshape(1, H).astype(f32)
    x2 = input_seq2.reshape(1, H).astype(f32)
    h0 = hidden.reshape(1, H).astype(f32)

    # Per-call activation block (tiny): row0 = [x1 | x2], row1 = [h | 0].
    x1p = jnp.pad(x1, ((0, 0), (0, Hp - H)))
    x2p = jnp.pad(x2, ((0, 0), (0, Hp - H)))
    hrow = jnp.pad(h0, ((0, 0), (0, 2 * Hp - H)))
    acts = jnp.concatenate([jnp.concatenate([x1p, x2p], axis=1), hrow], axis=0)
    enc = jnp.pad(encoder_output.astype(f32), ((0, Lp - L), (0, Hp - H)))

    kernel = functools.partial(_fused_kernel, hp=Hp, lp=Lp)
    vmem = pl.BlockSpec(memory_space=pltpu.MemorySpace.VMEM)
    out_pad = pl.pallas_call(
        kernel,
        out_shape=jax.ShapeDtypeStruct((1, Hp), f32),
        in_specs=[vmem, vmem, vmem, vmem],
        out_specs=vmem,
    )(acts, enc, packed["w"], packed["b"])

    h_new = out_pad[:, :H].reshape(1, 1, H)
    return h_new, h_new     # single GRU step: outputs == new hidden


def _reference(input_seq1, input_seq2, hidden, encoder_output, params):
    """Pure-JAX f32 reference of the same forward pass."""
    H = params["fc_w"].shape[0]
    x = jnp.concatenate([input_seq1[0].reshape(1, H),
                         input_seq2[0].reshape(1, H)], axis=1)            # (1, 2H)
    emb = jax.nn.relu(x @ params["fc_w"].T + params["fc_b"])              # (1, H)
    h0 = hidden[0].reshape(1, H)
    attn_logits = jnp.concatenate([emb, h0], axis=1) @ params["attn_w"].T + params["attn_b"]
    attn_w = jax.nn.softmax(attn_logits, axis=1)                          # (1, L)
    ctx = attn_w @ encoder_output                                         # (1, H)
    o = jax.nn.relu(jnp.concatenate([emb, ctx], axis=1) @ params["comb_w"].T
                    + params["comb_b"])                                   # (1, H)
    gi = o @ params["gru_w_ih"].T + params["gru_b_ih"]                    # (1, 3H)
    gh = h0 @ params["gru_w_hh"].T + params["gru_b_hh"]
    r = jax.nn.sigmoid(gi[:, 0:H] + gh[:, 0:H])
    z = jax.nn.sigmoid(gi[:, H:2 * H] + gh[:, H:2 * H])
    n = jnp.tanh(gi[:, 2 * H:] + r * gh[:, 2 * H:])
    h_new = (1.0 - z) * n + z * h0
    return h_new.reshape(1, 1, H), h_new.reshape(1, 1, H)


if __name__ == "__main__":
    H, L = 32, 30   # hidden_size=32, max_length=word_max_length=30
    key = jax.random.PRNGKey(0)
    ks = jax.random.split(key, 16)

    # Deterministic synthetic parameters (shapes from the module's __init__).
    # nn.Embedding(input_size, hidden_size) is declared but never used in
    # forward (inputs arrive pre-embedded), so it is omitted.
    params = {
        "fc_w":     0.1 * jax.random.normal(ks[0], (H, 2 * H), jnp.float32),
        "fc_b":     0.1 * jax.random.normal(ks[1], (H,), jnp.float32),
        "attn_w":   0.1 * jax.random.normal(ks[2], (L, 2 * H), jnp.float32),
        "attn_b":   0.1 * jax.random.normal(ks[3], (L,), jnp.float32),
        "comb_w":   0.1 * jax.random.normal(ks[4], (H, 2 * H), jnp.float32),
        "comb_b":   0.1 * jax.random.normal(ks[5], (H,), jnp.float32),
        "gru_w_ih": 0.1 * jax.random.normal(ks[6], (3 * H, H), jnp.float32),
        "gru_w_hh": 0.1 * jax.random.normal(ks[7], (3 * H, H), jnp.float32),
        "gru_b_ih": 0.1 * jax.random.normal(ks[8], (3 * H,), jnp.float32),
        "gru_b_hh": 0.1 * jax.random.normal(ks[9], (3 * H,), jnp.float32),
    }

    input_seq1 = jax.random.normal(ks[10], (1, 1, H), jnp.float32)
    input_seq2 = jax.random.normal(ks[11], (1, 1, H), jnp.float32)
    hidden = 0.1 * jax.random.normal(ks[12], (1, 1, H), jnp.float32)
    encoder_output = jax.random.normal(ks[13], (L, H), jnp.float32)

    packed = prepare_params(params)   # one-off: packed bf16 weights + f32 biases
    outputs, h_n = double_atten_combine_encoder_rnn(
        input_seq1, input_seq2, hidden, encoder_output, packed)
    jax.block_until_ready((outputs, h_n))

    ref_out, ref_h = _reference(input_seq1, input_seq2, hidden, encoder_output, params)
    assert outputs.shape == (1, 1, H) and h_n.shape == (1, 1, H)
    # bf16 MXU operands + approx reciprocal -> relaxed tolerance vs f32 reference.
    assert jnp.allclose(outputs, ref_out, atol=2e-2, rtol=2e-2)
    assert jnp.allclose(h_n, ref_h, atol=2e-2, rtol=2e-2)

    print("KERNEL_OK")
</pallas_src>

<mosaic_0001>
module attributes {stable_mosaic.version = 11 : i64} {
  func.func @_fused_kernel(%arg0: memref<2x256xf32, #tpu.memory_space<vmem>>, %arg1: memref<128x128xf32, #tpu.memory_space<vmem>>, %arg2: memref<256x768xbf16, #tpu.memory_space<vmem>>, %arg3: memref<8x256xf32, #tpu.memory_space<vmem>>, %arg4: memref<1x128xf32, #tpu.memory_space<vmem>>) attributes {dimension_semantics = [], scalar_prefetch = 0 : i64, scratch_operands = 0 : i64, tpu.core_type = #tpu.core_type<tc>} {
    %c0 = arith.constant 0 : index
    %c0_0 = arith.constant 0 : index
    %0 = vector.load %arg0[%c0, %c0_0] : memref<2x256xf32, #tpu.memory_space<vmem>>, vector<1x256xf32>
    %c1 = arith.constant 1 : index
    %c0_1 = arith.constant 0 : index
    %1 = vector.load %arg0[%c1, %c0_1] : memref<2x256xf32, #tpu.memory_space<vmem>>, vector<1x128xf32>
    %2 = arith.truncf %1 : vector<1x128xf32> to vector<1x128xbf16>
    %c0_2 = arith.constant 0 : index
    %c0_3 = arith.constant 0 : index
    %3 = vector.load %arg3[%c0_2, %c0_3] : memref<8x256xf32, #tpu.memory_space<vmem>>, vector<8x256xf32>
    %4 = arith.truncf %0 : vector<1x256xf32> to vector<1x256xbf16>
    %c0_4 = arith.constant 0 : index
    %c0_5 = arith.constant 0 : index
    %5 = vector.load %arg2[%c0_4, %c0_5] : memref<256x768xbf16, #tpu.memory_space<vmem>>, vector<256x128xbf16>
    %cst = arith.constant dense<0.000000e+00> : vector<1x128xf32>
    %6 = tpu.matmul %4, %5, %cst {dimension_numbers = #tpu.dot_dimension_numbers<[1], [0], [0], [1], [0, 0, 1, 1], [], []>} : vector<1x256xbf16>, vector<256x128xbf16>, vector<1x128xf32> -> vector<1x128xf32>
    %7 = vector.extract_strided_slice %3 {offsets = [0, 0], sizes = [1, 128], strides = [1, 1]} : vector<8x256xf32> to vector<1x128xf32>
    %8 = arith.addf %6, %7 : vector<1x128xf32>
    %cst_6 = arith.constant 0.000000e+00 : f32
    %9 = vector.broadcast %cst_6 : f32 to vector<1x128xf32>
    %10 = arith.maximumf %8, %9 : vector<1x128xf32>
    %11 = arith.truncf %10 : vector<1x128xf32> to vector<1x128xbf16>
    %12 = tpu.concatenate %11, %2 in 1 : vector<1x128xbf16>, vector<1x128xbf16> -> vector<1x256xbf16>
    %c0_7 = arith.constant 0 : index
    %c128 = arith.constant 128 : index
    %13 = vector.load %arg2[%c0_7, %c128] : memref<256x768xbf16, #tpu.memory_space<vmem>>, vector<256x128xbf16>
    %cst_8 = arith.constant dense<0.000000e+00> : vector<1x128xf32>
    %14 = tpu.matmul %12, %13, %cst_8 {dimension_numbers = #tpu.dot_dimension_numbers<[1], [0], [0], [1], [0, 0, 1, 1], [], []>} : vector<1x256xbf16>, vector<256x128xbf16>, vector<1x128xf32> -> vector<1x128xf32>
    %15 = vector.extract_strided_slice %3 {offsets = [1, 0], sizes = [1, 128], strides = [1, 1]} : vector<8x256xf32> to vector<1x128xf32>
    %16 = arith.addf %14, %15 : vector<1x128xf32>
    %cst_9 = arith.constant dense<0xFF800000> : vector<1xf32>
    %17 = vector.multi_reduction <maximumf>, %16, %cst_9 [1] : vector<1x128xf32> to vector<1xf32>
    %18 = vector.shape_cast %17 : vector<1xf32> to vector<1x1xf32>
    %19 = vector.broadcast %18 : vector<1x1xf32> to vector<1x128xf32>
    %20 = arith.subf %16, %19 : vector<1x128xf32>
    %21 = math.exp %20 : vector<1x128xf32>
    %cst_10 = arith.constant dense<0.000000e+00> : vector<1xf32>
    %22 = vector.multi_reduction <add>, %21, %cst_10 [1] : vector<1x128xf32> to vector<1xf32>
    %23 = vector.shape_cast %22 : vector<1xf32> to vector<1x1xf32>
    %24 = tpu.reciprocal %23 {approx = true} : vector<1x1xf32> -> vector<1x1xf32>
    %25 = arith.truncf %21 : vector<1x128xf32> to vector<1x128xbf16>
    %c0_11 = arith.constant 0 : index
    %c0_12 = arith.constant 0 : index
    %26 = vector.load %arg1[%c0_11, %c0_12] : memref<128x128xf32, #tpu.memory_space<vmem>>, vector<128x128xf32>
    %27 = arith.truncf %26 : vector<128x128xf32> to vector<128x128xbf16>
    %cst_13 = arith.constant dense<0.000000e+00> : vector<1x128xf32>
    %28 = tpu.matmul %25, %27, %cst_13 {dimension_numbers = #tpu.dot_dimension_numbers<[1], [0], [0], [1], [0, 0, 1, 1], [], []>} : vector<1x128xbf16>, vector<128x128xbf16>, vector<1x128xf32> -> vector<1x128xf32>
    %29 = vector.broadcast %24 : vector<1x1xf32> to vector<1x128xf32>
    %30 = arith.mulf %28, %29 : vector<1x128xf32>
    %31 = arith.truncf %30 : vector<1x128xf32> to vector<1x128xbf16>
    %32 = tpu.concatenate %11, %31 in 1 : vector<1x128xbf16>, vector<1x128xbf16> -> vector<1x256xbf16>
    %c0_14 = arith.constant 0 : index
    %c256 = arith.constant 256 : index
    %33 = vector.load %arg2[%c0_14, %c256] : memref<256x768xbf16, #tpu.memory_space<vmem>>, vector<256x128xbf16>
    %cst_15 = arith.constant dense<0.000000e+00> : vector<1x128xf32>
    %34 = tpu.matmul %32, %33, %cst_15 {dimension_numbers = #tpu.dot_dimension_numbers<[1], [0], [0], [1], [0, 0, 1, 1], [], []>} : vector<1x256xbf16>, vector<256x128xbf16>, vector<1x128xf32> -> vector<1x128xf32>
    %35 = vector.extract_strided_slice %3 {offsets = [2, 0], sizes = [1, 128], strides = [1, 1]} : vector<8x256xf32> to vector<1x128xf32>
    %36 = arith.addf %34, %35 : vector<1x128xf32>
    %cst_16 = arith.constant 0.000000e+00 : f32
    %37 = vector.broadcast %cst_16 : f32 to vector<1x128xf32>
    %38 = arith.maximumf %36, %37 : vector<1x128xf32>
    %39 = arith.truncf %38 : vector<1x128xf32> to vector<1x128xbf16>
    %40 = tpu.concatenate %39, %2 in 1 : vector<1x128xbf16>, vector<1x128xbf16> -> vector<1x256xbf16>
    %c0_17 = arith.constant 0 : index
    %c384 = arith.constant 384 : index
    %41 = vector.load %arg2[%c0_17, %c384] : memref<256x768xbf16, #tpu.memory_space<vmem>>, vector<256x256xbf16>
    %cst_18 = arith.constant dense<0.000000e+00> : vector<1x256xf32>
    %42 = tpu.matmul %40, %41, %cst_18 {dimension_numbers = #tpu.dot_dimension_numbers<[1], [0], [0], [1], [0, 0, 1, 1], [], []>} : vector<1x256xbf16>, vector<256x256xbf16>, vector<1x256xf32> -> vector<1x256xf32>
    %43 = vector.extract_strided_slice %3 {offsets = [3, 0], sizes = [1, 256], strides = [1, 1]} : vector<8x256xf32> to vector<1x256xf32>
    %44 = arith.addf %42, %43 : vector<1x256xf32>
    %45 = arith.negf %44 : vector<1x256xf32>
    %46 = math.exp %45 : vector<1x256xf32>
    %cst_19 = arith.constant 1.000000e+00 : f32
    %47 = vector.broadcast %cst_19 : f32 to vector<1x256xf32>
    %48 = arith.addf %47, %46 : vector<1x256xf32>
    %49 = arith.divf %47, %48 : vector<1x256xf32>
    %50 = vector.extract_strided_slice %49 {offsets = [0, 0], sizes = [1, 128], strides = [1, 1]} : vector<1x256xf32> to vector<1x128xf32>
    %51 = vector.extract_strided_slice %49 {offsets = [0, 128], sizes = [1, 128], strides = [1, 1]} : vector<1x256xf32> to vector<1x128xf32>
    %c0_20 = arith.constant 0 : index
    %c640 = arith.constant 640 : index
    %52 = vector.load %arg2[%c0_20, %c640] : memref<256x768xbf16, #tpu.memory_space<vmem>>, vector<128x128xbf16>
    %cst_21 = arith.constant dense<0.000000e+00> : vector<1x128xf32>
    %53 = tpu.matmul %39, %52, %cst_21 {dimension_numbers = #tpu.dot_dimension_numbers<[1], [0], [0], [1], [0, 0, 1, 1], [], []>} : vector<1x128xbf16>, vector<128x128xbf16>, vector<1x128xf32> -> vector<1x128xf32>
    %54 = vector.extract_strided_slice %3 {offsets = [4, 0], sizes = [1, 128], strides = [1, 1]} : vector<8x256xf32> to vector<1x128xf32>
    %55 = arith.addf %53, %54 : vector<1x128xf32>
    %c128_22 = arith.constant 128 : index
    %c640_23 = arith.constant 640 : index
    %56 = vector.load %arg2[%c128_22, %c640_23] : memref<256x768xbf16, #tpu.memory_space<vmem>>, vector<128x128xbf16>
    %cst_24 = arith.constant dense<0.000000e+00> : vector<1x128xf32>
    %57 = tpu.matmul %2, %56, %cst_24 {dimension_numbers = #tpu.dot_dimension_numbers<[1], [0], [0], [1], [0, 0, 1, 1], [], []>} : vector<1x128xbf16>, vector<128x128xbf16>, vector<1x128xf32> -> vector<1x128xf32>
    %58 = vector.extract_strided_slice %3 {offsets = [5, 0], sizes = [1, 128], strides = [1, 1]} : vector<8x256xf32> to vector<1x128xf32>
    %59 = arith.addf %57, %58 : vector<1x128xf32>
    %60 = arith.mulf %50, %59 : vector<1x128xf32>
    %61 = arith.addf %55, %60 : vector<1x128xf32>
    %62 = math.tanh %61 : vector<1x128xf32>
    %cst_25 = arith.constant 1.000000e+00 : f32
    %63 = vector.broadcast %cst_25 : f32 to vector<1x128xf32>
    %64 = arith.subf %63, %51 : vector<1x128xf32>
    %65 = arith.mulf %64, %62 : vector<1x128xf32>
    %66 = arith.mulf %51, %1 : vector<1x128xf32>
    %67 = arith.addf %65, %66 : vector<1x128xf32>
    %c0_26 = arith.constant 0 : index
    %c0_27 = arith.constant 0 : index
    %68 = vector.load %arg4[%c0_26, %c0_27] : memref<1x128xf32, #tpu.memory_space<vmem>>, vector<1x128xf32>
    tpu.vector_store %arg4[%c0_26, %c0_27], %67 {strides = array<i32>} : memref<1x128xf32, #tpu.memory_space<vmem>>, vector<1x128xf32>,
    return
  }
}

</mosaic_0001>

<bundles_post_ra>
// kernel: tpu_custom_call.1
= control target key start
LH: loop header
LB: loop body
LE: loop exit
PB: predicated region body
PF: predicated region fallthrough
CT: control target
= control target key end

     0   :  { %9 = vsyncpa [#allocation3], 0  ;;  %s1822_s0 = inlined_call_operand.hbm [shape: f32[2,256], index: 0, kind: input, shape index: {}]   ;;  %s1823_s1 = inlined_call_operand.hbm [shape: f32[128,128], index: 1, kind: input, shape index: {}]   ;;  %s1824_s2 = inlined_call_operand.hbm [shape: bf16[256,768], index: 2, kind: input, shape index: {}]   ;;  %s1825_s3 = inlined_call_operand.hbm [shape: f32[8,256], index: 3, kind: input, shape index: {}]   ;;  %s1826_s4 = inlined_call_operand.hbm [shape: f32[1,128], index: 4, kind: output, shape index: {}]  }
   0x1   :  { %10 = vsyncpa [#allocation6], 0 }
   0x2   :  { %11 = vsyncpa [#allocation9], 0 }
   0x3   :  { %12 = vsyncpa [#allocation4], 0  ;;  %s1672_s15 = smov [#allocation5]   ;;  %s1554_s19 = scalar_lea.hbm %s1823_s1, 2048 }
   0x4   :  { %s28_s16 = sshll.u32 %s1672_s15, 4  ;;  %p1555_p0 = scmp.ne.s32.totalorder %s1823_s1, %s1554_s19  ;;  %s29_s16 = int_to_ptr.vmem [resolvable:$true] %s28_s16 }
   0x5   :  { %p1558_p1 = scmp.lt.u32.totalorder %s1554_s19, %s1823_s1 }
   0x7   :  { %p1560_p2 = pnand %p1558_p1, %p1555_p0 }
   0x9   :  { %1563 = shalt.err (!%p1560_p2)
}
   0xa   :  { %s1564_s24 = scalar_lea.vmem %s29_s16, 2048  ;;  %p1569_p4 = scmp.lt.s32.totalorder %s29_s16, %s29_s16 }
   0xb   :  { %p1565_p3 = scmp.ne.s32.totalorder %s29_s16, %s1564_s24  ;;  %p1570_p5 = scmp.lt.s32.totalorder %s1564_s24, %s1564_s24 }
   0xd   :  { %p1571_p6 = por %p1570_p5, %p1569_p4 }
   0xf   :  { %p1572_p7 = pnand %p1571_p6, %p1565_p3 }
  0x11   :  { %1575 = shalt.err (!%p1572_p7)
}
  0x12   :  { %s1673_s25 = smov 128   ;;  %s1674_s26 = smov 8  }
  0x13   :  { %34 = dma.hbm_to_vmem [thread:$0]  %s1823_s1, 2048, %s29_s16, [#allocation6], %s1673_s25, %s1673_s25, %s1674_s26  }
  0x14   :  { %s1675_s29 = smov [#allocation2]   ;;  %s1676_s5 = smov [#allocation7]  }
  0x15   :  { %s19_s30 = sshll.u32 %s1675_s29, 4  ;;  %s40_s6 = sshll.u32 %s1676_s5, 4  ;;  %s20_s30 = int_to_ptr.vmem [resolvable:$true] %s19_s30  ;;  %s41_s6 = int_to_ptr.vmem [resolvable:$true] %s40_s6 }
  0x16   :  { %s1576_s9 = scalar_lea.hbm %s1822_s0, 64 }
  0x17   :  { %p1577_p8 = scmp.ne.s32.totalorder %s1822_s0, %s1576_s9  ;;  %p1580_p9 = scmp.lt.u32.totalorder %s1576_s9, %s1822_s0 }
  0x19   :  { %p1582_p10 = pnand %p1580_p9, %p1577_p8 }
  0x1b   :  { %1585 = shalt.err (!%p1582_p10)
}
  0x1c   :  { %s1586_s1 = scalar_lea.vmem %s20_s30, 64  ;;  %p1591_p12 = scmp.lt.s32.totalorder %s20_s30, %s20_s30 }
  0x1d   :  { %p1587_p11 = scmp.ne.s32.totalorder %s20_s30, %s1586_s1  ;;  %p1592_p13 = scmp.lt.s32.totalorder %s1586_s1, %s1586_s1 }
  0x1f   :  { %p1593_p0 = por %p1592_p13, %p1591_p12 }
  0x21   :  { %p1594_p1 = pnand %p1593_p0, %p1587_p11 }
  0x23   :  { %1597 = shalt.err (!%p1594_p1)
}
  0x24   :  { %22 = dma.hbm_to_vmem [thread:$0]  %s1822_s0, 64, %s20_s30, [#allocation3]  }
  0x25   :  { %s1598_s18 = scalar_lea.hbm %s1824_s2, 12288 }
  0x26   :  { %p1599_p2 = scmp.ne.s32.totalorder %s1824_s2, %s1598_s18  ;;  %p1602_p3 = scmp.lt.u32.totalorder %s1598_s18, %s1824_s2 }
  0x28   :  { %p1604_p4 = pnand %p1602_p3, %p1599_p2 }
  0x2a   :  { %1607 = shalt.err (!%p1604_p4)
}
  0x2b   :  { %s1608_s23 = scalar_lea.vmem %s41_s6, 12288  ;;  %p1613_p6 = scmp.lt.s32.totalorder %s41_s6, %s41_s6 }
  0x2c   :  { %p1609_p5 = scmp.ne.s32.totalorder %s41_s6, %s1608_s23  ;;  %p1614_p7 = scmp.lt.s32.totalorder %s1608_s23, %s1608_s23 }
  0x2e   :  { %p1615_p8 = por %p1614_p7, %p1613_p6 }
  0x30   :  { %p1616_p9 = pnand %p1615_p8, %p1609_p5 }
  0x32   :  { %1619 = shalt.err (!%p1616_p9)
}
  0x33   :  { %s1677_s0 = smov 384   ;;  %s1678_s24 = smov 24  }
  0x34   :  { %46 = dma.hbm_to_vmem [thread:$0]  %s1824_s2, 12288, %s41_s6, [#allocation6], %s1677_s0, %s1677_s0, %s1678_s24  }
  0x35   :  { %s1679_s27 = smov [#allocation8]   ;;  %s1620_s5 = scalar_lea.hbm %s1825_s3, 256 }
  0x36   :  { %s53_s28 = sshll.u32 %s1679_s27, 4  ;;  %p1621_p10 = scmp.ne.s32.totalorder %s1825_s3, %s1620_s5  ;;  %s54_s28 = int_to_ptr.vmem [resolvable:$true] %s53_s28 }
  0x37   :  { %p1624_p11 = scmp.lt.u32.totalorder %s1620_s5, %s1825_s3 }
  0x39   :  { %p1626_p12 = pnand %p1624_p11, %p1621_p10 }
  0x3b   :  { %1629 = shalt.err (!%p1626_p12)
}
  0x3c   :  { %s1630_s11 = scalar_lea.vmem %s54_s28, 256  ;;  %p1635_p0 = scmp.lt.s32.totalorder %s54_s28, %s54_s28 }
  0x3d   :  { %p1631_p13 = scmp.ne.s32.totalorder %s54_s28, %s1630_s11  ;;  %p1636_p1 = scmp.lt.s32.totalorder %s1630_s11, %s1630_s11 }
  0x3f   :  { %p1637_p2 = por %p1636_p1, %p1635_p0 }
  0x41   :  { %p1638_p3 = pnand %p1637_p2, %p1631_p13 }
  0x43   :  { %1641 = shalt.err (!%p1638_p3)
}
  0x44   :  { %56 = dma.hbm_to_vmem [thread:$0]  %s1825_s3, 256, %s54_s28, [#allocation9]  }
  0x45   :  { %1664 = dma.done.wait [#allocation3], 64  }
  0x46   :  { %1665 = vsyncadd [#allocation3], 4294967232 }
  0x47   :  { %1666 = dma.done.wait [#allocation6], 14336  }
  0x48   :  { %1667 = vsyncadd [#allocation6], 4294952960 }
  0x49   :  { %1668 = dma.done.wait [#allocation9], 256  }
  0x4a   :  { %1669 = vsyncadd [#allocation9], 4294967040  ;;  %v1428_v0 = vld [vmem:[#allocation7 + $0x180] ss:$24 sps:$4 sm:$0xff]   ;;  %v1430_v2 = vld [vmem:[#allocation7 + $0x1b0] ss:$24 sps:$4 sm:$0xff]   ;;  %v76_v5 = vlaneseq }
  0x4b   :  { %v1429_v1 = vld [vmem:[#allocation7] ss:$24 sps:$4 sm:$0xff]   ;;  %1264 = vmatprep.subr.bf16.mxu0 %v1428_v0  ;;  %v1431_v3 = vld [vmem:[#allocation7 + $0x30] ss:$24 sps:$4 sm:$0xff]   ;;  %v1444_v18 = vld [vmem:[#allocation7 + $0x184] ss:$24 sps:$4 sm:$0xff]  }
  0x4c   :  { %1265 = vmatpush3.bf16.msra.mxu0 %v1429_v1  ;;  %v1432_v4 = vld [vmem:[#allocation7 + $0x1e0] ss:$24 sps:$4 sm:$0xff]   ;;  %v1434_v7 = vld [vmem:[#allocation7 + $0x210] ss:$24 sps:$4 sm:$0xff]   ;;  %v77_v8 = vshrl.u32 %v76_v5, 7  ;;  %1286 = vmatprep.subr.bf16.mxu1 %v1444_v18  ;;  %v1680_v55 = vmov 0.0  }
  0x4d   :  { %1266 = vmatprep.subr.bf16.mxu0 %v1430_v2  ;;  %v1433_v6 = vld [vmem:[#allocation7 + $0x60] ss:$24 sps:$4 sm:$0xff]   ;;  %v1435_v9 = vld [vmem:[#allocation7 + $0x90] ss:$24 sps:$4 sm:$0xff]   ;;  %v1445_v20 = vld [vmem:[#allocation7 + $0x4] ss:$24 sps:$4 sm:$0xff]  }
  0x4e   :  { %v1436_v10 = vld [vmem:[#allocation7 + $0x240] ss:$24 sps:$4 sm:$0xff]   ;;  %v78_v11 = vsub.s32 0, %v77_v8  ;;  %v82_v12 = vsub.s32 1, %v77_v8  ;;  %v1438_v14 = vld [vmem:[#allocation7 + $0x270] ss:$24 sps:$4 sm:$0xff]   ;;  %1287 = vmatpush3.bf16.msra.mxu1 %v1445_v20 }
  0x4f   :  { %v1437_v13 = vld [vmem:[#allocation7 + $0xc0] ss:$24 sps:$4 sm:$0xff]   ;;  %v70_v15 = vld [vmem:[#allocation2] ss:$2 sm:$0x3]  ;;  %v442_v53 = vld [vmem:[#allocation5 + $0x8] sm:$0xff] }
  0x50   :  { %1267 = vmatpush3.bf16.msra.mxu0 %v1431_v3  ;;  %v1439_v16 = vld [vmem:[#allocation7 + $0xf0] ss:$24 sps:$4 sm:$0xff]   ;;  %v83_v17 = vrot.slane %v70_v15, %v82_v12  ;;  %v1440_v19 = vld [vmem:[#allocation7 + $0x2a0] ss:$24 sps:$4 sm:$0xff]   ;;  %v1446_v22 = vld [vmem:[#allocation7 + $0x1b4] ss:$24 sps:$4 sm:$0xff]   ;;  %v79_v30 = vrot.slane %v70_v15, %v78_v11 }
  0x51   :  { %1268 = vmatprep.subr.bf16.mxu0 %v1432_v4  ;;  %v1447_v23 = vld [vmem:[#allocation7 + $0x34] ss:$24 sps:$4 sm:$0xff]   ;;  %1288 = vmatprep.subr.bf16.mxu1 %v1446_v22  ;;  %v1448_v24 = vld [vmem:[#allocation7 + $0x1e4] ss:$24 sps:$4 sm:$0xff]   ;;  %v1441_v25 = vld [vmem:[#allocation7 + $0x120] ss:$24 sps:$4 sm:$0xff]  }
  0x52   :  { %v87_v21 = vpack.c.bf16 %v83_v17, %v83_v17  ;;  %v1442_v26 = vld [vmem:[#allocation7 + $0x2d0] ss:$24 sps:$4 sm:$0xff]   ;;  %1289 = vmatpush3.bf16.msra.mxu1 %v1447_v23  ;;  %v1449_v27 = vld [vmem:[#allocation7 + $0x64] ss:$24 sps:$4 sm:$0xff]   ;;  %v1450_v28 = vld [vmem:[#allocation7 + $0x214] ss:$24 sps:$4 sm:$0xff]   ;;  %v86_v33 = vpack.c.bf16 %v79_v30, %v79_v30 }
  0x53   :  { %1290 = vmatprep.subr.bf16.mxu1 %v1448_v24  ;;  %v1443_v29 = vld [vmem:[#allocation7 + $0x150] ss:$24 sps:$4 sm:$0xff]   ;;  %v1451_v31 = vld [vmem:[#allocation7 + $0x94] ss:$24 sps:$4 sm:$0xff]   ;;  %v1452_v32 = vld [vmem:[#allocation7 + $0x244] ss:$24 sps:$4 sm:$0xff]  }
  0x54   :  { %1269 = vmatpush3.bf16.msra.mxu0 %v1433_v6  ;;  %248 = vmatprep.mubr.bf16.mxu0 %v87_v21  ;;  %v1453_v34 = vld [vmem:[#allocation7 + $0xc4] ss:$24 sps:$4 sm:$0xff]   ;;  %v1454_v35 = vld [vmem:[#allocation7 + $0x274] ss:$24 sps:$4 sm:$0xff]   ;;  %vm429_vm0 = vcmask 1040384   ;;  %vm1681_vm1 = vmmov 0  }
  0x55   :  { %1270 = vmatprep.subr.bf16.mxu0 %v1434_v7  ;;  %v1455_v36 = vld [vmem:[#allocation7 + $0xf4] ss:$24 sps:$4 sm:$0xff]   ;;  %v1456_v37 = vld [vmem:[#allocation7 + $0x2a4] ss:$24 sps:$4 sm:$0xff]   ;;  %v1463_v30 = vld [vmem:[#allocation7 + $0x38] ss:$24 sps:$4 sm:$0xff]  }
  0x56   :  { %1291 = vmatpush3.bf16.msra.mxu1 %v1449_v27  ;;  %v1457_v38 = vld [vmem:[#allocation7 + $0x124] ss:$24 sps:$4 sm:$0xff]   ;;  %v1458_v39 = vld [vmem:[#allocation7 + $0x2d4] ss:$24 sps:$4 sm:$0xff]   ;;  %v1460_v27 = vld [vmem:[#allocation7 + $0x188] ss:$24 sps:$4 sm:$0xff]  }
  0x57   :  { %1292 = vmatprep.subr.bf16.mxu1 %v1450_v28  ;;  %v1459_v40 = vld [vmem:[#allocation7 + $0x154] ss:$24 sps:$4 sm:$0xff]   ;;  %v1756_v41 = vld [vmem:[#allocation2 + $0x1] sm:$0x1]  ;;  %v1763_v44 = vld [vmem:[#allocation8] sm:$0xff]  ;;  %s1682_s3 = smov [#allocation10]  }
  0x58   :  { %1271 = vmatpush3.bf16.msra.mxu0 %v1435_v9  ;;  %v1760_v42 = vpack.c.bf16 %v1756_v41, %v1756_v41  ;;  %v441_v52 = vld [vmem:[#allocation5] sm:$0xff]  ;;  %v443_v54 = vld [vmem:[#allocation5 + $0x10] sm:$0xff]  ;;  %v444_v57 = vld [vmem:[#allocation5 + $0x18] sm:$0xff]  ;;  %v387_v2 = vrot.slane %v1763_v44, 1  ;;  %s1155_s12 = sshll.u32 %s1682_s3, 4  ;;  %s1156_s12 = int_to_ptr.vmem [resolvable:$true] %s1155_s12 }
  0x59   :  { %1272 = vmatprep.subr.bf16.mxu0 %v1436_v10  ;;  %v457_v56 = vpack.c.bf16 %v442_v53, %v441_v52  ;;  %v458_v58 = vpack.c.bf16 %v444_v57, %v443_v54  ;;  %v445_v59 = vld [vmem:[#allocation5 + $0x20] sm:$0xff]  ;;  %v446_v60 = vld [vmem:[#allocation5 + $0x28] sm:$0xff]  ;;  %v447_v62 = vld [vmem:[#allocation5 + $0x30] sm:$0xff]  ;;  %s1642_s13 = scalar_lea.vmem %s1156_s12, 16  ;;  %s1646_s1 = scalar_lea.vmem %s1156_s12, 32 }
  0x5a   :  { %1293 = vmatpush3.bf16.msra.mxu1 %v1451_v31  ;;  %421 = vmatprep.mubr.bf16.mxu1 %v1760_v42  ;;  %v459_v61 = vpack.c.bf16 %v446_v60, %v445_v59  ;;  %v448_v63 = vld [vmem:[#allocation5 + $0x38] sm:$0xff]  ;;  %v449_v9 = vld [vmem:[#allocation5 + $0x40] sm:$0xff]  ;;  %v450_v10 = vld [vmem:[#allocation5 + $0x48] sm:$0xff]  ;;  %p1643_p4 = scmp.ne.s32.totalorder %s1156_s12, %s1642_s13  ;;  %p1647_p5 = scmp.lt.s32.totalorder %s1156_s12, %s1156_s12 }
  0x5b   :  { %1294 = vmatprep.subr.bf16.mxu1 %v1452_v32  ;;  %v460_v0 = vpack.c.bf16 %v448_v63, %v447_v62  ;;  %v461_v11 = vpack.c.bf16 %v450_v10, %v449_v9  ;;  %v451_v12 = vld [vmem:[#allocation5 + $0x50] sm:$0xff]  ;;  %v453_v15 = vld [vmem:[#allocation5 + $0x60] sm:$0xff]  ;;  %p1648_p6 = scmp.lt.s32.totalorder %s1646_s1, %s1642_s13 }
  0x5c   :  { %1273 = vmatpush3.bf16.msra.mxu0 %v1437_v13  ;;  %v452_v13 = vld [vmem:[#allocation5 + $0x58] sm:$0xff]  ;;  %v455_v18 = vld [vmem:[#allocation5 + $0x70] sm:$0xff]  ;;  %v1461_v28 = vld [vmem:[#allocation7 + $0x8] ss:$24 sps:$4 sm:$0xff]  }
  0x5d   :  { %1274 = vmatprep.subr.bf16.mxu0 %v1438_v14  ;;  %v462_v14 = vpack.c.bf16 %v452_v13, %v451_v12  ;;  %v1464_v31 = vld [vmem:[#allocation7 + $0x1e8] ss:$24 sps:$4 sm:$0xff]   ;;  %v1482_v52 = vld [vmem:[#allocation7 + $0x6c] ss:$24 sps:$4 sm:$0xff]   ;;  %v1485_v54 = vld [vmem:[#allocation7 + $0x9c] ss:$24 sps:$4 sm:$0xff]   ;;  %p1649_p7 = por %p1648_p6, %p1647_p5 }
  0x5e   :  { %1295 = vmatpush3.bf16.msra.mxu1 %v1453_v34  ;;  %v1465_v32 = vld [vmem:[#allocation7 + $0x68] ss:$24 sps:$4 sm:$0xff]   ;;  %v1467_v34 = vld [vmem:[#allocation7 + $0x98] ss:$24 sps:$4 sm:$0xff]   ;;  %v1488_v57 = vld [vmem:[#allocation7 + $0xcc] ss:$24 sps:$4 sm:$0xff]  }
  0x5f   :  { %1296 = vmatprep.subr.bf16.mxu1 %v1454_v35  ;;  %v1468_v35 = vld [vmem:[#allocation7 + $0x248] ss:$24 sps:$4 sm:$0xff]   ;;  %v1491_v59 = vld [vmem:[#allocation7 + $0xfc] ss:$24 sps:$4 sm:$0xff]   ;;  %v1516_v9 = vld [vmem:[#allocation7 + $0x24c] ss:$24 sps:$4 sm:$0xff]   ;;  %p1650_p8 = pnand %p1649_p7, %p1643_p4 }
  0x60   :  { %1275 = vmatpush3.bf16.msra.mxu0 %v1439_v16  ;;  %v454_v16 = vld [vmem:[#allocation5 + $0x68] sm:$0xff]  ;;  %v1487_v53 = vld [vmem:[#allocation7 + $0xa0] ss:$24 sps:$4 sm:$0xff]   ;;  %v1497_v63 = vld [vmem:[#allocation7 + $0x15c] ss:$24 sps:$4 sm:$0xff]  }
  0x61   :  { %1276 = vmatprep.subr.bf16.mxu0 %v1440_v19  ;;  %v463_v17 = vpack.c.bf16 %v454_v16, %v453_v15  ;;  %v456_v19 = vld [vmem:[#allocation5 + $0x78] sm:$0xff]  ;;  %v1496_v60 = vld [vmem:[#allocation7 + $0x130] ss:$24 sps:$4 sm:$0xff]  }
  0x62   :  { %1297 = vmatpush3.bf16.msra.mxu1 %v1455_v36  ;;  %v464_v20 = vpack.c.bf16 %v456_v19, %v455_v18  ;;  %v1469_v36 = vld [vmem:[#allocation7 + $0xc8] ss:$24 sps:$4 sm:$0xff]  }
  0x63   :  { %1298 = vmatprep.subr.bf16.mxu1 %v1456_v37  ;;  %v1470_v37 = vld [vmem:[#allocation7 + $0x278] ss:$24 sps:$4 sm:$0xff]  }
  0x64   :  { %1277 = vmatpush3.bf16.msra.mxu0 %v1441_v25  ;;  %v1499_v62 = vld [vmem:[#allocation7 + $0x160] ss:$24 sps:$4 sm:$0xff]  }
  0x65   :  { %1278 = vmatprep.subr.bf16.mxu0 %v1442_v26  ;;  %v1522_v10 = vld [vmem:[#allocation7 + $0x280] ss:$24 sps:$4 sm:$0xff]  }
  0x66   :  { %1299 = vmatpush3.bf16.msra.mxu1 %v1457_v38  ;;  %v1471_v38 = vld [vmem:[#allocation7 + $0xf8] ss:$24 sps:$4 sm:$0xff]  }
  0x67   :  { %1300 = vmatprep.subr.bf16.mxu1 %v1458_v39  ;;  %v1472_v39 = vld [vmem:[#allocation7 + $0x2a8] ss:$24 sps:$4 sm:$0xff]  }
  0x68   :  { %1279 = vmatpush3.bf16.msra.mxu0 %v1443_v29  ;;  %v1462_v29 = vld [vmem:[#allocation7 + $0x1b8] ss:$24 sps:$4 sm:$0xff]  }
  0x69   :  { %1357 = vmatprep.subr.bf16.mxu0 %v1680_v55 }
  0x6a   :  { %1301 = vmatpush3.bf16.msra.mxu1 %v1459_v40  ;;  %v1473_v40 = vld [vmem:[#allocation7 + $0x128] ss:$24 sps:$4 sm:$0xff]  }
  0x6b   :  { %249 = vmatmul.mubr.bf16.vlgmr.msra.gmra.mrb[0].mxu0 %v86_v33  ;;  %1317 = vmatprep.subr.bf16.mxu1 %v1460_v27  ;;  %v1466_v33 = vld [vmem:[#allocation7 + $0x218] ss:$24 sps:$4 sm:$0xff]   ;;  %v1524_v27 = vld [vmem:[#allocation7 + $0x2ac] ss:$24 sps:$4 sm:$0xff]  }
  0x6c   :  { %1358 = vmatpush3.bf16.msra.mxu0 %v457_v56  ;;  %1373 = vmatprep.mubr.msk.bf16.mxu0 %vm1681_vm1, %v1680_v55  ;;  %v1490_v56 = vld [vmem:[#allocation7 + $0xd0] ss:$24 sps:$4 sm:$0xff]  }
  0x6d   :  { %1359 = vmatprep.subr.bf16.mxu0 %v1680_v55 }
  0x70   :  { %1360 = vmatpush3.bf16.msra.mxu0 %v458_v58  ;;  %v1493_v58 = vld [vmem:[#allocation7 + $0x100] ss:$24 sps:$4 sm:$0xff]  }
  0x71   :  { %1361 = vmatprep.subr.bf16.mxu0 %v1680_v55 }
  0x74   :  { %1362 = vmatpush3.bf16.msra.mxu0 %v459_v61  ;;  %v1494_v61 = vld [vmem:[#allocation7 + $0x12c] ss:$24 sps:$4 sm:$0xff]  }
  0x75   :  { %1363 = vmatprep.subr.bf16.mxu0 %v1680_v55 }
  0x78   :  { %1364 = vmatpush3.bf16.msra.mxu0 %v460_v0  ;;  %v1502_v0 = vld [vmem:[#allocation7 + $0x190] ss:$24 sps:$4 sm:$0xff]  }
  0x79   :  { %1365 = vmatprep.subr.bf16.mxu0 %v1680_v55 }
  0x7c   :  { %1366 = vmatpush3.bf16.msra.mxu0 %v461_v11  ;;  %v1520_v11 = vld [vmem:[#allocation7 + $0x27c] ss:$24 sps:$4 sm:$0xff]  }
  0x7d   :  { %1367 = vmatprep.subr.bf16.mxu0 %v1680_v55 }
  0x80   :  { %1368 = vmatpush3.bf16.msra.mxu0 %v462_v14 }
  0x81   :  { %1369 = vmatprep.subr.bf16.mxu0 %v1680_v55 }
  0x84   :  { %1370 = vmatpush3.bf16.msra.mxu0 %v463_v17 }
  0x85   :  { %1371 = vmatprep.subr.bf16.mxu0 %v1680_v55 }
  0x88   :  { %1372 = vmatpush3.bf16.msra.mxu0 %v464_v20  ;;  %v1503_v20 = vld [vmem:[#allocation7 + $0x14] ss:$24 sps:$4 sm:$0xff]  }
 0x13e   :  { %v1280_v43 = vpop.f32.mrb[0].mxu0 }
 0x13f   :  { %v1281_v45 = vpop.f32.mrb[1].mxu0 }
 0x140   :  { %v1282_v46 = vadd.f32 %v1281_v45, %v1280_v43  ;;  %v1283_v47 = vpop.f32.mrb[2].mxu0  ;;  %v1474_v43 = vld [vmem:[#allocation7 + $0x2d8] ss:$24 sps:$4 sm:$0xff]  }
 0x141   :  { %v1284_v48 = vpop.f32.mrb[3].mxu0  ;;  %v1475_v45 = vld [vmem:[#allocation7 + $0x158] ss:$24 sps:$4 sm:$0xff]  }
 0x142   :  { %v251_v49 = vadd.f32 %v1282_v46, %v1763_v44  ;;  %v1476_v46 = vld [vmem:[#allocation7 + $0xc] ss:$24 sps:$4 sm:$0xff]   ;;  %v1478_v47 = vld [vmem:[#allocation7 + $0x10] ss:$24 sps:$4 sm:$0xff]   ;;  %v1481_v48 = vld [vmem:[#allocation7 + $0x40] ss:$24 sps:$4 sm:$0xff]  }
 0x143   :  { %876 = vmatprep.subr.bf16.mxu0 %v1478_v47  ;;  %v1536_v47 = vld [vmem:[#allocation7 + $0x254] ss:$24 sps:$4 sm:$0xff]  }
 0x144   :  { %v256_v50 = vmax.f32 %v251_v49, 0.0  ;;  %v1479_v49 = vld [vmem:[#allocation7 + $0x3c] ss:$24 sps:$4 sm:$0xff]  }
 0x146   :  { %v1766_v51 = vpack.c.bf16 %v256_v50, %v256_v50  ;;  %v1484_v50 = vld [vmem:[#allocation7 + $0x70] ss:$24 sps:$4 sm:$0xff]  }
 0x148   :  { %422 = vmatmul.mubr.bf16.vlgmr.msra.gmra.mrb[0].mxu1 %v1766_v51 }
 0x149   :  { %1318 = vmatpush3.bf16.msra.mxu1 %v1461_v28  ;;  %v1530_v28 = vld [vmem:[#allocation7 + $0x2e0] ss:$24 sps:$4 sm:$0xff]  }
 0x14a   :  { %1319 = vmatprep.subr.bf16.mxu1 %v1462_v29  ;;  %v1531_v29 = vld [vmem:[#allocation7 + $0x164] ss:$24 sps:$4 sm:$0xff]  }
 0x14d   :  { %1320 = vmatpush3.bf16.msra.mxu1 %v1463_v30  ;;  %v1528_v30 = vld [vmem:[#allocation7 + $0x2dc] ss:$24 sps:$4 sm:$0xff]  }
 0x14e   :  { %1321 = vmatprep.subr.bf16.mxu1 %v1464_v31 }
 0x151   :  { %1322 = vmatpush3.bf16.msra.mxu1 %v1465_v32  ;;  %v635_v32 = vrot.slane %v1763_v44, 2 }
 0x152   :  { %1323 = vmatprep.subr.bf16.mxu1 %v1466_v33 }
 0x155   :  { %1324 = vmatpush3.bf16.msra.mxu1 %v1467_v34 }
 0x156   :  { %1325 = vmatprep.subr.bf16.mxu1 %v1468_v35 }
 0x159   :  { %1326 = vmatpush3.bf16.msra.mxu1 %v1469_v36 }
 0x15a   :  { %1327 = vmatprep.subr.bf16.mxu1 %v1470_v37 }
 0x15d   :  { %1328 = vmatpush3.bf16.msra.mxu1 %v1471_v38 }
 0x15e   :  { %1329 = vmatprep.subr.bf16.mxu1 %v1472_v39  ;;  %v1532_v39 = vld [vmem:[#allocation7 + $0x194] ss:$24 sps:$4 sm:$0xff]  }
 0x161   :  { %1330 = vmatpush3.bf16.msra.mxu1 %v1473_v40 }
 0x162   :  { %1331 = vmatprep.subr.bf16.mxu1 %v1474_v43  ;;  %v1533_v43 = vld [vmem:[#allocation7 + $0x1c4] ss:$24 sps:$4 sm:$0xff]  }
 0x165   :  { %1332 = vmatpush3.bf16.msra.mxu1 %v1475_v45  ;;  %v1534_v45 = vld [vmem:[#allocation7 + $0x1f4] ss:$24 sps:$4 sm:$0xff]  }
 0x166   :  { %1377 = vmatprep.subr.bf16.mxu1 %v1680_v55 }
 0x21b   :  { %v1302_v1 = vpop.f32.mrb[0].mxu1 }
 0x21c   :  { %v1303_v3 = vpop.f32.mrb[1].mxu1 }
 0x21d   :  { %v1304_v4 = vadd.f32 %v1303_v3, %v1302_v1  ;;  %v1305_v5 = vpop.f32.mrb[2].mxu1  ;;  %v1500_v1 = vld [vmem:[#allocation7 + $0x18c] ss:$24 sps:$4 sm:$0xff]   ;;  %v1504_v3 = vld [vmem:[#allocation7 + $0x1bc] ss:$24 sps:$4 sm:$0xff]  }
 0x21e   :  { %v1306_v6 = vpop.f32.mrb[3].mxu1  ;;  %v1508_v5 = vld [vmem:[#allocation7 + $0x1ec] ss:$24 sps:$4 sm:$0xff]  }
 0x21f   :  { %v424_v7 = vadd.f32 %v1304_v4, %v387_v2  ;;  %v1506_v2 = vld [vmem:[#allocation7 + $0x1c0] ss:$24 sps:$4 sm:$0xff]   ;;  %v1510_v4 = vld [vmem:[#allocation7 + $0x1f0] ss:$24 sps:$4 sm:$0xff]  }
 0x220   :  { %v1514_v6 = vld [vmem:[#allocation7 + $0x220] ss:$24 sps:$4 sm:$0xff]  }
 0x221   :  { %v430_v8 = vsel %vm429_vm0, %v424_v7, -inf }
 0x222   :  { %431 = vmax.xlane.f32.xlu0 %v430_v8  ;;  %v1518_v8 = vld [vmem:[#allocation7 + $0x250] ss:$24 sps:$4 sm:$0xff]  }
 0x2af   :  { %v432_v21 = vpop.xlane.xlu0 %431 }
 0x2b0   :  { %v433_v22 = vsub.f32 %v424_v7, %v432_v21  ;;  %v1512_v7 = vld [vmem:[#allocation7 + $0x21c] ss:$24 sps:$4 sm:$0xff]  }
 0x2b1   :  { %v1507_v21 = vld [vmem:[#allocation7 + $0x44] ss:$24 sps:$4 sm:$0xff]  }
 0x2b2   :  { %v434_v23 = vmul.f32 1.442695, %v433_v22  ;;  %v1511_v22 = vld [vmem:[#allocation7 + $0x74] ss:$24 sps:$4 sm:$0xff]  }
 0x2b4   :  { %1540 = vpow2.f32 %v434_v23  ;;  %v1515_v23 = vld [vmem:[#allocation7 + $0xa4] ss:$24 sps:$4 sm:$0xff]  }
 0x2be   :  { %v1541_v24 = vpop.eup %1540 }
 0x2bf   :  { %v436_v25 = vsel %vm429_vm0, %v1541_v24, 0.0  ;;  %v440_v26 = vpack.c.bf16 %v1541_v24, %v1541_v24  ;;  %v1519_v24 = vld [vmem:[#allocation7 + $0xd4] ss:$24 sps:$4 sm:$0xff]  }
 0x2c0   :  { %437 = vadd.xlane.f32.xlu0 %v436_v25  ;;  %v1526_v25 = vld [vmem:[#allocation7 + $0x2b0] ss:$24 sps:$4 sm:$0xff]  }
 0x2c1   :  { %1374 = vmatmul.mubr.bf16.vlgmr.msra.gmra.mrb[4].mxu0 %v440_v26  ;;  %v1527_v26 = vld [vmem:[#allocation7 + $0x134] ss:$24 sps:$4 sm:$0xff]  }
 0x2c2   :  { %908 = vmatprep.mubr.bf16.mxu0 %v1760_v42  ;;  %877 = vmatpush1.bf16.msra.mxu0 %v1476_v46  ;;  %v1535_v46 = vld [vmem:[#allocation7 + $0x224] ss:$24 sps:$4 sm:$0xff]  }
 0x2c3   :  { %878 = vmatprep.subr.bf16.mxu0 %v1481_v48  ;;  %v1537_v48 = vld [vmem:[#allocation7 + $0x284] ss:$24 sps:$4 sm:$0xff]  }
 0x2c6   :  { %879 = vmatpush1.bf16.msra.mxu0 %v1479_v49  ;;  %v1538_v49 = vld [vmem:[#allocation7 + $0x2b4] ss:$24 sps:$4 sm:$0xff]  }
 0x2c7   :  { %880 = vmatprep.subr.bf16.mxu0 %v1484_v50  ;;  %v1539_v50 = vld [vmem:[#allocation7 + $0x2e4] ss:$24 sps:$4 sm:$0xff]  }
 0x2ca   :  { %881 = vmatpush1.bf16.msra.mxu0 %v1482_v52  ;;  %v872_v52 = vrot.slane %v1763_v44, 3 }
 0x2cb   :  { %882 = vmatprep.subr.bf16.mxu0 %v1487_v53 }
 0x2ce   :  { %883 = vmatpush1.bf16.msra.mxu0 %v1485_v54 }
 0x2cf   :  { %884 = vmatprep.subr.bf16.mxu0 %v1490_v56 }
 0x2d2   :  { %885 = vmatpush1.bf16.msra.mxu0 %v1488_v57 }
 0x2d3   :  { %886 = vmatprep.subr.bf16.mxu0 %v1493_v58 }
 0x2d6   :  { %887 = vmatpush1.bf16.msra.mxu0 %v1491_v59 }
 0x2d7   :  { %888 = vmatprep.subr.bf16.mxu0 %v1496_v60 }
 0x2da   :  { %889 = vmatpush1.bf16.msra.mxu0 %v1494_v61 }
 0x2db   :  { %890 = vmatprep.subr.bf16.mxu0 %v1499_v62  ;;  %v74_v62 = vld [vmem:[#allocation8 + $0x8] sm:$0xff] }
 0x2de   :  { %891 = vmatpush1.bf16.msra.mxu0 %v1497_v63 }
 0x2df   :  { %892 = vmatprep.subr.bf16.mxu0 %v1502_v0 }
 0x2e2   :  { %893 = vmatpush1.bf16.msra.mxu0 %v1500_v1  ;;  %v873_v1 = vrot.slane %v74_v62, 3 }
 0x2e3   :  { %894 = vmatprep.subr.bf16.mxu0 %v1506_v2 }
 0x2e6   :  { %895 = vmatpush1.bf16.msra.mxu0 %v1504_v3 }
 0x2e7   :  { %896 = vmatprep.subr.bf16.mxu0 %v1510_v4 }
 0x2ea   :  { %897 = vmatpush1.bf16.msra.mxu0 %v1508_v5  ;;  %v1099_v5 = vrot.slane %v1763_v44, 5 }
 0x2eb   :  { %898 = vmatprep.subr.bf16.mxu0 %v1514_v6  ;;  %v993_v6 = vrot.slane %v1763_v44, 4 }
 0x2ee   :  { %899 = vmatpush1.bf16.msra.mxu0 %v1512_v7 }
 0x2ef   :  { %900 = vmatprep.subr.bf16.mxu0 %v1518_v8 }
 0x2f2   :  { %901 = vmatpush1.bf16.msra.mxu0 %v1516_v9 }
 0x2f3   :  { %902 = vmatprep.subr.bf16.mxu0 %v1522_v10 }
 0x2f6   :  { %903 = vmatpush1.bf16.msra.mxu0 %v1520_v11 }
 0x2f7   :  { %904 = vmatprep.subr.bf16.mxu0 %v1526_v25 }
 0x2fa   :  { %905 = vmatpush1.bf16.msra.mxu0 %v1524_v27 }
 0x2fb   :  { %906 = vmatprep.subr.bf16.mxu0 %v1530_v28 }
 0x2fe   :  { %907 = vmatpush1.bf16.msra.mxu0 %v1528_v30 }
 0x34d   :  { %v438_v12 = vpop.xlane.xlu0 %437 }
 0x34e   :  { %1542 = vrcp.f32 %v438_v12 }
 0x358   :  { %v1543_v13 = vpop.eup %1542 }
 0x394   :  { %v499_v14 = vpop.f32.mrb[4].mxu0 }
 0x395   :  { %v505_v15 = vmul.f32 %v1543_v13, %v499_v14  ;;  %v1375_v16 = vpop.f32.mrb[5].mxu0 }
 0x396   :  { %v502_v17 = vpop.f32.mrb[6].mxu0 }
 0x397   :  { %v506_v18 = vpack.c.bf16 %v505_v15, %v505_v15  ;;  %v1376_v19 = vpop.f32.mrb[7].mxu0 }
 0x399   :  { %669 = vmatprep.mubr.bf16.mxu1 %v506_v18 }
 0x39a   :  { %670 = vmatmul.mubr.bf16.vlgmr.msra.gmra.mrb[4].mxu1 %v1766_v51  ;;  %v1523_v51 = vld [vmem:[#allocation7 + $0x104] ss:$24 sps:$4 sm:$0xff]  }
 0x39b   :  { %1378 = vmatpush3.bf16.msra.mxu1 %v1503_v20  ;;  %1393 = vmatprep.mubr.msk.bf16.mxu1 %vm1681_vm1, %v1680_v55 }
 0x39c   :  { %1379 = vmatprep.subr.bf16.mxu1 %v1680_v55 }
 0x39f   :  { %1380 = vmatpush3.bf16.msra.mxu1 %v1507_v21 }
 0x3a0   :  { %1381 = vmatprep.subr.bf16.mxu1 %v1680_v55 }
 0x3a3   :  { %1382 = vmatpush3.bf16.msra.mxu1 %v1511_v22 }
 0x3a4   :  { %1383 = vmatprep.subr.bf16.mxu1 %v1680_v55 }
 0x3a7   :  { %1384 = vmatpush3.bf16.msra.mxu1 %v1515_v23 }
 0x3a8   :  { %1385 = vmatprep.subr.bf16.mxu1 %v1680_v55 }
 0x3ab   :  { %1386 = vmatpush3.bf16.msra.mxu1 %v1519_v24 }
 0x3ac   :  { %1387 = vmatprep.subr.bf16.mxu1 %v1680_v55 }
 0x3af   :  { %1388 = vmatpush3.bf16.msra.mxu1 %v1523_v51 }
 0x3b0   :  { %1389 = vmatprep.subr.bf16.mxu1 %v1680_v55 }
 0x3b3   :  { %1390 = vmatpush3.bf16.msra.mxu1 %v1527_v26 }
 0x3b4   :  { %1391 = vmatprep.subr.bf16.mxu1 %v1680_v55 }
 0x3b7   :  { %1392 = vmatpush3.bf16.msra.mxu1 %v1531_v29 }
 0x3b8   :  { %1397 = vmatprep.subr.bf16.mxu1 %v1680_v55 }
 0x46d   :  { %v1333_v31 = vpop.f32.mrb[4].mxu1 }
 0x46e   :  { %v1334_v33 = vpop.f32.mrb[5].mxu1 }
 0x46f   :  { %v1335_v34 = vadd.f32 %v1334_v33, %v1333_v31  ;;  %v1336_v35 = vpop.f32.mrb[6].mxu1 }
 0x470   :  { %v1337_v36 = vpop.f32.mrb[7].mxu1 }
 0x471   :  { %v672_v37 = vadd.f32 %v1335_v34, %v635_v32 }
 0x473   :  { %v677_v38 = vmax.f32 %v672_v37, 0.0 }
 0x475   :  { %v678_v40 = vpack.c.bf16 %v677_v38, %v677_v38 }
 0x477   :  { %909 = vmatmul.mubr.bf16.vlgmr.msra.gmra.mrb[8].mxu0 %v678_v40  ;;  %1394 = vmatmul.mubr.bf16.vlgmr.msra.gmra.mrb[8].mxu1 %v678_v40 }
 0x478   :  { %1398 = vmatpush3.bf16.msra.mxu1 %v1532_v39  ;;  %1413 = vmatprep.mubr.msk.bf16.mxu1 %vm1681_vm1, %v1680_v55 }
 0x479   :  { %1399 = vmatprep.subr.bf16.mxu1 %v1680_v55 }
 0x47c   :  { %1400 = vmatpush3.bf16.msra.mxu1 %v1533_v43 }
 0x47d   :  { %1401 = vmatprep.subr.bf16.mxu1 %v1680_v55 }
 0x480   :  { %1402 = vmatpush3.bf16.msra.mxu1 %v1534_v45 }
 0x481   :  { %1403 = vmatprep.subr.bf16.mxu1 %v1680_v55 }
 0x484   :  { %1404 = vmatpush3.bf16.msra.mxu1 %v1535_v46 }
 0x485   :  { %1405 = vmatprep.subr.bf16.mxu1 %v1680_v55 }
 0x488   :  { %1406 = vmatpush3.bf16.msra.mxu1 %v1536_v47 }
 0x489   :  { %1407 = vmatprep.subr.bf16.mxu1 %v1680_v55 }
 0x48c   :  { %1408 = vmatpush3.bf16.msra.mxu1 %v1537_v48 }
 0x48d   :  { %1409 = vmatprep.subr.bf16.mxu1 %v1680_v55 }
 0x490   :  { %1410 = vmatpush3.bf16.msra.mxu1 %v1538_v49 }
 0x491   :  { %1411 = vmatprep.subr.bf16.mxu1 %v1680_v55 }
 0x494   :  { %1412 = vmatpush3.bf16.msra.mxu1 %v1539_v50 }
 0x497   :  { %1414 = vmatmul.mubr.bf16.vlgmr.msra.gmra.mrb[12].mxu1 %v1760_v42 }
 0x54a   :  { %v910_v53 = vpop.f32.mrb[8].mxu0  ;;  %v1029_v54 = vpop.f32.mrb[8].mxu1 }
 0x54b   :  { %v911_v56 = vadd.f32 %v910_v53, %v872_v52  ;;  %v912_v57 = vpop.f32.mrb[9].mxu0  ;;  %v1395_v58 = vpop.f32.mrb[9].mxu1  ;;  %v1030_v13 = vadd.f32 %v1029_v54, %v993_v6 }
 0x54c   :  { %v914_v59 = vpop.f32.mrb[10].mxu0  ;;  %v1032_v60 = vpop.f32.mrb[10].mxu1  ;;  %v913_v2 = vadd.f32 %v912_v57, %v873_v1 }
 0x54d   :  { %v1246_v61 = vmul.f32 -1.442695, %v911_v56  ;;  %v915_v63 = vpop.f32.mrb[11].mxu0  ;;  %v1396_v0 = vpop.f32.mrb[11].mxu1 }
 0x54e   :  { %v1247_v55 = vmul.f32 -1.442695, %v913_v2 }
 0x54f   :  { %1544 = vpow2.f32 %v1246_v61 }
 0x550   :  { %1546 = vpow2.f32 %v1247_v55 }
 0x559   :  { %v1545_v3 = vpop.eup %1544 }
 0x55a   :  { %v923_v42 = vadd.f32 1.0, %v1545_v3  ;;  %v1547_v4 = vpop.eup %1546 }
 0x55b   :  { %v924_v7 = vadd.f32 1.0, %v1547_v4 }
 0x55c   :  { %1548 = vrcp.f32 %v923_v42 }
 0x55d   :  { %1550 = vrcp.f32 %v924_v7 }
 0x566   :  { %v1549_v11 = vpop.eup %1548 }
 0x567   :  { %v1551_v17 = vpop.eup %1550 }
 0x568   :  { %v1144_v18 = vsub.f32 1.0, %v1551_v17  ;;  %v1146_v44 = vmul.f32 %v1551_v17, %v1756_v41 }
 0x56a   :  { %v1135_v8 = vpop.f32.mrb[12].mxu1 }
 0x56b   :  { %v1136_v9 = vadd.f32 %v1135_v8, %v1099_v5  ;;  %v1415_v10 = vpop.f32.mrb[13].mxu1 }
 0x56c   :  { %v1138_v12 = vpop.f32.mrb[14].mxu1 }
 0x56d   :  { %v1141_v14 = vmul.f32 %v1549_v11, %v1136_v9  ;;  %v1416_v15 = vpop.f32.mrb[15].mxu1 }
 0x56f   :  { %v1142_v16 = vadd.f32 %v1141_v14, %v1030_v13 }
 0x571   :  { %1552 = vtanh.f32 %v1142_v16 }
 0x57b   :  { %v1553_v19 = vpop.eup %1552 }
 0x57c   :  { %v1145_v20 = vmul.f32 %v1553_v19, %v1144_v18 }
 0x57e   :  { %v1147_v21 = vadd.f32 %v1146_v44, %v1145_v20 }
 0x580   :  { %1148 = vst [vmem:[#allocation10] sm:$0x1] %v1147_v21 }
 0x581   :  { %1653 = shalt.err (!%p1650_p8)
}
 0x582   :  { %s1654_s16 = scalar_lea.hbm %s1826_s4, 16 }
 0x583   :  { %p1655_p9 = scmp.ne.s32.totalorder %s1826_s4, %s1654_s16  ;;  %p1658_p10 = scmp.lt.u32.totalorder %s1654_s16, %s1826_s4 }
 0x585   :  { %p1660_p11 = pnand %p1658_p10, %p1655_p9 }
 0x587   :  { %1663 = shalt.err (!%p1660_p11)
}
 0x588   :  { %1158 = dma.vmem_to_hbm [thread:$0]  %s1156_s12, 16, %s1826_s4, [#allocation4]  }
 0x589   :  { %1670 = dma.done.wait [#allocation4], 16  }
 0x58a   :  { %1671 = vsyncadd [#allocation4], 4294967280 }
 0x58b   :  { %1162 = vsyncpa [#allocation3], 1 }
 0x58c   :  { %1163 = vsyncpa [#allocation6], 1 }
 0x58d   :  { %1164 = vsyncpa [#allocation9], 1 }
 0x58e   :  { %1165 = vsyncpa [#allocation4], 1 }

</bundles_post_ra>
